<compile_context>
chip_gen: v7x
topology: tpu7x:2x2x1
jax: 0.10.0
libtpu: 0.0.40
codegen_flags: <defaults>
</compile_context>

<pallas_src>
import functools

import jax
import jax.numpy as jnp
from jax.experimental import pallas as pl
from jax.experimental.pallas import tpu as pltpu


def _attn_kernel(q_ref, k_ref, v_ref, wq_ref, bq_ref, wk_ref, bk_ref,
                 wv_ref, bv_ref, *rest, emit_attn, compute_dtype):
    if emit_attn:
        ctx_ref, attn_ref, q_scr, acc_scr = rest
    else:
        ctx_ref, q_scr, acc_scr = rest
        attn_ref = None

    s_idx = pl.program_id(1)
    n_s = pl.num_programs(1)
    bt, kq, h = q_ref.shape
    _, st, _ = k_ref.shape
    cdt = compute_dtype

    # Once per batch tile (first S chunk): project q, zero the ctx accumulator.
    # The flatten (bt,K,H)->(bt*K,H) is a free sublane collapse when K % 8 == 0.
    @pl.when(s_idx == 0)
    def _():
        q_rows = q_ref[...].reshape(bt * kq, h)            # already bf16
        qp = (jnp.dot(q_rows, wq_ref[...], preferred_element_type=jnp.float32)
              + bq_ref[...])                               # scale folded into wq/bq
        q_scr[...] = qp.reshape(bt, kq, h).astype(cdt)
        acc_scr[...] = jnp.zeros_like(acc_scr)

    # Per (batch tile, S chunk): k/v projections as single big MXU matmuls.
    k_rows = k_ref[...].reshape(bt * st, h)
    v_rows = v_ref[...].reshape(bt * st, h)
    kp = (jnp.dot(k_rows, wk_ref[...], preferred_element_type=jnp.float32)
          + bk_ref[...]).reshape(bt, st, h)
    vp = (jnp.dot(v_rows, wv_ref[...], preferred_element_type=jnp.float32)
          + bv_ref[...]).reshape(bt, st, h)

    # Scaled dot-product scores (bt, K, st); contract last dims directly.
    # TODO(synk): confirm in the Mosaic dump that this does not lower to a
    # per-step XLU transpose of k; if it does at real K/S, feed k as (H, S).
    scores = jnp.einsum("bkh,bsh->bks", q_scr[...], kp.astype(cdt),
                        preferred_element_type=jnp.float32)

    # Softmax over the *query* axis (torch nn.Softmax(dim=1) on (B, K, S)).
    # K is never tiled across grid steps, so this is exact for every S chunk.
    m = jnp.max(scores, axis=1, keepdims=True)
    e = jnp.exp(scores - m)
    attn = e * pl.reciprocal(jnp.sum(e, axis=1, keepdims=True), approx=True)

    if emit_attn:
        attn_ref[...] = attn.astype(attn_ref.dtype)

    # Partial context for this S chunk, accumulated in f32 scratch.
    acc_scr[...] += jnp.einsum("bks,bsh->bkh", attn.astype(cdt), vp.astype(cdt),
                               preferred_element_type=jnp.float32)

    @pl.when(s_idx == n_s - 1)
    def _():
        ctx_ref[...] = acc_scr[...].astype(ctx_ref.dtype)


def scaled_dot_attention(queries, keys, values, params, *,
                         block_b=None, block_s=None,
                         compute_dtype=jnp.bfloat16,
                         return_attention=True,
                         vmem_limit_bytes=32 * 1024 * 1024,
                         weight_buffers=None):
    """params = (wq, bq, wk, bk, wv, bv); w* are (H_in, H_out), b* are (1, H)."""
    wq, bq, wk, bk, wv, bv = params
    B, K, H = queries.shape
    _, S, _ = keys.shape
    out_dtype = queries.dtype

    # Batch tiling: aim for >= 4 grid steps so input DMA / output writeback is
    # software-pipelined against compute and the "parallel" axis can shard
    # across both v7x TensorCores, while keeping the batch tile as big as
    # possible for MXU row occupancy (v5e/v6e are single-TC; pipelining is
    # still the win there).
    if block_b is None:
        block_b = max(1, B // 4)
        while B % block_b:
            block_b -= 1
    assert B % block_b == 0, "block_b must divide the batch size"

    # S tiling ("arbitrary" axis). At real sizes pick block_s as a multiple of
    # 128 (lane-dense attn stores + (8,128) tiling) and size it against the
    # per-generation VMEM budget; the toy S=8 uses one full-S chunk.
    if block_s is None:
        block_s = S
    assert S % block_s == 0, "block_s must divide S"
    assert block_s == S or block_s % 128 == 0, \
        "block_s must be the full S or a multiple of 128"
    n_b, n_s = B // block_b, S // block_s

    # Fold 1/sqrt(H) into the Q projection (zero in-kernel cost) and pre-cast
    # weights to the MXU compute dtype. Biases stay f32 (added to f32 acc).
    scale = jax.lax.rsqrt(jnp.float32(H))
    wq_c = (wq.astype(jnp.float32) * scale).astype(compute_dtype)
    bq_c = bq.astype(jnp.float32) * scale
    wk_c = wk.astype(compute_dtype)
    wv_c = wv.astype(compute_dtype)
    bk_c = bk.astype(jnp.float32)
    bv_c = bv.astype(jnp.float32)

    # Pre-cast activations to bf16 outside the kernel: halves HBM->VMEM DMA
    # bytes and the double-buffered input VMEM footprint (biggest relative
    # win on v5e; also helps the v7x 64 MiB budget).
    q_in = queries.astype(compute_dtype)
    k_in = keys.astype(compute_dtype)
    v_in = values.astype(compute_dtype)

    # Weight/bias blocks: constant index_map (loaded once). On v7x at large H
    # pass weight_buffers=1 so the three HxH weights are not double-buffered;
    # at toy H this is irrelevant, so leave the default pipelining.
    w_kwargs = {}
    if weight_buffers is not None:
        w_kwargs = dict(pipeline_mode=pl.Buffered(weight_buffers))
    w_spec = pl.BlockSpec((H, H), lambda b, s: (0, 0), **w_kwargs)
    b_spec = pl.BlockSpec((1, H), lambda b, s: (0, 0), **w_kwargs)

    in_specs = [
        pl.BlockSpec((block_b, K, H), lambda b, s: (b, 0, 0)),         # queries
        pl.BlockSpec((block_b, block_s, H), lambda b, s: (b, s, 0)),   # keys
        pl.BlockSpec((block_b, block_s, H), lambda b, s: (b, s, 0)),   # values
        w_spec, b_spec,   # Wq (pre-scaled), bq (pre-scaled)
        w_spec, b_spec,   # Wk, bk
        w_spec, b_spec,   # Wv, bv
    ]

    ctx_spec = pl.BlockSpec((block_b, K, H), lambda b, s: (b, 0, 0))
    ctx_shape = jax.ShapeDtypeStruct((B, K, H), out_dtype)
    if return_attention:
        out_specs = [ctx_spec,
                     pl.BlockSpec((block_b, K, block_s), lambda b, s: (b, 0, s))]
        out_shape = (ctx_shape, jax.ShapeDtypeStruct((B, K, S), out_dtype))
    else:
        out_specs = [ctx_spec]
        out_shape = (ctx_shape,)

    grid_spec = pltpu.PrefetchScalarGridSpec(
        num_scalar_prefetch=0,
        grid=(n_b, n_s),
        in_specs=in_specs,
        out_specs=out_specs,
        scratch_shapes=[
            pltpu.VMEM((block_b, K, H), compute_dtype),   # cached projected q
            pltpu.VMEM((block_b, K, H), jnp.float32),     # ctx accumulator
        ],
    )

    # Advisory cost so XLA can schedule/overlap surrounding ops.
    flops = int(2 * B * (K + 2 * S) * H * H     # 3 projections
                + 2 * B * K * S * H             # scores
                + 2 * B * K * S * H)            # context
    itemsize_in = jnp.dtype(compute_dtype).itemsize
    bytes_accessed = int(
        (B * K * H + 2 * B * S * H) * itemsize_in
        + 3 * H * H * itemsize_in + 3 * H * 4
        + (B * K * H + (B * K * S if return_attention else 0))
        * jnp.dtype(out_dtype).itemsize)
    cost = pl.CostEstimate(flops=flops, transcendentals=int(B * K * S),
                           bytes_accessed=bytes_accessed)

    kernel = functools.partial(_attn_kernel, emit_attn=return_attention,
                               compute_dtype=compute_dtype)

    outs = pl.pallas_call(
        kernel,
        out_shape=out_shape,
        grid_spec=grid_spec,
        cost_estimate=cost,
        compiler_params=pltpu.CompilerParams(
            dimension_semantics=("parallel", "arbitrary"),
            vmem_limit_bytes=vmem_limit_bytes),
    )(q_in, k_in, v_in, wq_c, bq_c, wk_c, bk_c, wv_c, bv_c)

    if return_attention:
        return outs
    return outs[0]


def _reference(queries, keys, values, params):
    wq, bq, wk, bk, wv, bv = params
    H = queries.shape[-1]
    q = queries @ wq + bq
    k = keys @ wk + bk
    v = values @ wv + bv
    scores = jnp.einsum("bkh,bsh->bks", q, k) * jax.lax.rsqrt(jnp.float32(H))
    attn = jax.nn.softmax(scores, axis=1)  # torch nn.Softmax(dim=1)
    ctx = jnp.einsum("bks,bsh->bkh", attn, v)
    return ctx, attn


if __name__ == "__main__":
    # B=8 -> 4 batch-tile grid steps of block_b=2 (pipelined, v7x dual-TC OK).
    B, K, S, H = 8, 8, 8, 32

    key = jax.random.PRNGKey(0)
    ks = jax.random.split(key, 9)
    queries = jax.random.normal(ks[0], (B, K, H), dtype=jnp.float32)
    keys_in = jax.random.normal(ks[1], (B, S, H), dtype=jnp.float32)
    values = jax.random.normal(ks[2], (B, S, H), dtype=jnp.float32)

    # Deterministic parameter init (nn.Linear(hidden, hidden) x3: weight + bias).
    def init_linear(kw, kb):
        w = jax.random.normal(kw, (H, H), dtype=jnp.float32) * 0.1  # (in, out) == torch W.T
        b = jax.random.normal(kb, (1, H), dtype=jnp.float32) * 0.1
        return w, b

    wq, bq = init_linear(ks[3], ks[4])
    wk, bk = init_linear(ks[5], ks[6])
    wv, bv = init_linear(ks[7], ks[8])
    params = (wq, bq, wk, bk, wv, bv)

    ctx, attn = scaled_dot_attention(queries, keys_in, values, params)
    jax.block_until_ready((ctx, attn))

    ctx_ref, attn_ref = _reference(queries, keys_in, values, params)
    assert ctx.shape == (B, K, H) and attn.shape == (B, K, S)
    # bf16 activations/weights + approx reciprocal => bf16-level tolerances
    # against the f32 reference.
    assert jnp.allclose(ctx, ctx_ref, atol=2e-2, rtol=2e-2)
    assert jnp.allclose(attn, attn_ref, atol=2e-2, rtol=2e-2)
    # Softmax over the query axis (torch dim=1) must sum to ~1 over K.
    assert jnp.allclose(jnp.sum(attn, axis=1), jnp.ones((B, S)), atol=2e-2)

    # ctx-only variant (drops the B*K*S attention writeback entirely).
    ctx_only = scaled_dot_attention(queries, keys_in, values, params,
                                    return_attention=False)
    jax.block_until_ready(ctx_only)
    assert jnp.allclose(ctx_only, ctx, atol=1e-6, rtol=1e-6)

    print("KERNEL_OK")
</pallas_src>

<mosaic_0001>
module attributes {stable_mosaic.version = 11 : i64} {
  func.func @_attn_kernel(%arg0: i32, %arg1: i32, %arg2: memref<2x8x32xbf16, #tpu.memory_space<vmem>>, %arg3: memref<2x8x32xbf16, #tpu.memory_space<vmem>>, %arg4: memref<2x8x32xbf16, #tpu.memory_space<vmem>>, %arg5: memref<32x32xbf16, #tpu.memory_space<vmem>>, %arg6: memref<1x32xf32, #tpu.memory_space<vmem>>, %arg7: memref<32x32xbf16, #tpu.memory_space<vmem>>, %arg8: memref<1x32xf32, #tpu.memory_space<vmem>>, %arg9: memref<32x32xbf16, #tpu.memory_space<vmem>>, %arg10: memref<1x32xf32, #tpu.memory_space<vmem>>, %arg11: memref<2x8x32xf32, #tpu.memory_space<vmem>>, %arg12: memref<2x8x8xf32, #tpu.memory_space<vmem>>, %arg13: memref<2x8x32xbf16, #tpu.memory_space<vmem>>, %arg14: memref<2x8x32xf32, #tpu.memory_space<vmem>>) attributes {dimension_semantics = [#tpu.dimension_semantics<parallel>, #tpu.dimension_semantics<arbitrary>], iteration_bounds = array<i64: 4, 1>, scalar_prefetch = 0 : i64, scratch_operands = 2 : i64, tpu.core_type = #tpu.core_type<tc>, window_params = [{transform_indices = @transform_0, window_bounds = array<i64: 2, 8, 32>}, {transform_indices = @transform_1, window_bounds = array<i64: 2, 8, 32>}, {transform_indices = @transform_2, window_bounds = array<i64: 2, 8, 32>}, {pipeline_mode = #tpu.pipeline_mode<synchronous>, transform_indices = @transform_3, window_bounds = array<i64: 32, 32>}, {pipeline_mode = #tpu.pipeline_mode<synchronous>, transform_indices = @transform_4, window_bounds = array<i64: 1, 32>}, {pipeline_mode = #tpu.pipeline_mode<synchronous>, transform_indices = @transform_5, window_bounds = array<i64: 32, 32>}, {pipeline_mode = #tpu.pipeline_mode<synchronous>, transform_indices = @transform_6, window_bounds = array<i64: 1, 32>}, {pipeline_mode = #tpu.pipeline_mode<synchronous>, transform_indices = @transform_7, window_bounds = array<i64: 32, 32>}, {pipeline_mode = #tpu.pipeline_mode<synchronous>, transform_indices = @transform_8, window_bounds = array<i64: 1, 32>}, {transform_indices = @transform_9, window_bounds = array<i64: 2, 8, 32>}, {transform_indices = @transform_10, window_bounds = array<i64: 2, 8, 8>}]} {
    %c0_i32 = arith.constant 0 : i32
    %0 = arith.cmpi eq, %arg1, %c0_i32 : i32
    %1 = arith.extui %0 : i1 to i32
    %c0_i32_0 = arith.constant 0 : i32
    %2 = arith.cmpi ne, %1, %c0_i32_0 : i32
    scf.if %2 {
      %c0_33 = arith.constant 0 : index
      %c0_34 = arith.constant 0 : index
      %c0_35 = arith.constant 0 : index
      %42 = vector.load %arg2[%c0_33, %c0_34, %c0_35] : memref<2x8x32xbf16, #tpu.memory_space<vmem>>, vector<2x8x32xbf16>
      %43 = vector.shape_cast %42 : vector<2x8x32xbf16> to vector<16x32xbf16>
      %c0_36 = arith.constant 0 : index
      %c0_37 = arith.constant 0 : index
      %44 = vector.load %arg5[%c0_36, %c0_37] : memref<32x32xbf16, #tpu.memory_space<vmem>>, vector<32x32xbf16>
      %cst_38 = arith.constant dense<0.000000e+00> : vector<16x32xf32>
      %45 = tpu.matmul %43, %44, %cst_38 {dimension_numbers = #tpu.dot_dimension_numbers<[1], [0], [0], [1], [0, 0, 1, 1], [], []>} : vector<16x32xbf16>, vector<32x32xbf16>, vector<16x32xf32> -> vector<16x32xf32>
      %c0_39 = arith.constant 0 : index
      %c0_40 = arith.constant 0 : index
      %46 = vector.load %arg6[%c0_39, %c0_40] : memref<1x32xf32, #tpu.memory_space<vmem>>, vector<1x32xf32>
      %47 = vector.broadcast %46 : vector<1x32xf32> to vector<16x32xf32>
      %48 = arith.addf %45, %47 : vector<16x32xf32>
      %49 = vector.shape_cast %48 : vector<16x32xf32> to vector<2x8x32xf32>
      %50 = arith.truncf %49 : vector<2x8x32xf32> to vector<2x8x32xbf16>
      %c0_41 = arith.constant 0 : index
      %c0_42 = arith.constant 0 : index
      %c0_43 = arith.constant 0 : index
      %51 = vector.load %arg13[%c0_41, %c0_42, %c0_43] : memref<2x8x32xbf16, #tpu.memory_space<vmem>>, vector<2x8x32xbf16>
      tpu.vector_store %arg13[%c0_41, %c0_42, %c0_43], %50 {strides = array<i32>} : memref<2x8x32xbf16, #tpu.memory_space<vmem>>, vector<2x8x32xbf16>,
      %cst_44 = arith.constant 0.000000e+00 : f32
      %52 = vector.broadcast %cst_44 : f32 to vector<2x8x32xf32>
      %c0_45 = arith.constant 0 : index
      %c0_46 = arith.constant 0 : index
      %c0_47 = arith.constant 0 : index
      %53 = vector.load %arg14[%c0_45, %c0_46, %c0_47] : memref<2x8x32xf32, #tpu.memory_space<vmem>>, vector<2x8x32xf32>
      tpu.vector_store %arg14[%c0_45, %c0_46, %c0_47], %52 {strides = array<i32>} : memref<2x8x32xf32, #tpu.memory_space<vmem>>, vector<2x8x32xf32>,
    } else {
    }
    %c0 = arith.constant 0 : index
    %c0_1 = arith.constant 0 : index
    %c0_2 = arith.constant 0 : index
    %3 = vector.load %arg3[%c0, %c0_1, %c0_2] : memref<2x8x32xbf16, #tpu.memory_space<vmem>>, vector<2x8x32xbf16>
    %4 = vector.shape_cast %3 : vector<2x8x32xbf16> to vector<16x32xbf16>
    %c0_3 = arith.constant 0 : index
    %c0_4 = arith.constant 0 : index
    %c0_5 = arith.constant 0 : index
    %5 = vector.load %arg4[%c0_3, %c0_4, %c0_5] : memref<2x8x32xbf16, #tpu.memory_space<vmem>>, vector<2x8x32xbf16>
    %6 = vector.shape_cast %5 : vector<2x8x32xbf16> to vector<16x32xbf16>
    %c0_6 = arith.constant 0 : index
    %c0_7 = arith.constant 0 : index
    %7 = vector.load %arg7[%c0_6, %c0_7] : memref<32x32xbf16, #tpu.memory_space<vmem>>, vector<32x32xbf16>
    %cst = arith.constant dense<0.000000e+00> : vector<16x32xf32>
    %8 = tpu.matmul %4, %7, %cst {dimension_numbers = #tpu.dot_dimension_numbers<[1], [0], [0], [1], [0, 0, 1, 1], [], []>} : vector<16x32xbf16>, vector<32x32xbf16>, vector<16x32xf32> -> vector<16x32xf32>
    %c0_8 = arith.constant 0 : index
    %c0_9 = arith.constant 0 : index
    %9 = vector.load %arg8[%c0_8, %c0_9] : memref<1x32xf32, #tpu.memory_space<vmem>>, vector<1x32xf32>
    %10 = vector.broadcast %9 : vector<1x32xf32> to vector<16x32xf32>
    %11 = arith.addf %8, %10 : vector<16x32xf32>
    %12 = vector.shape_cast %11 : vector<16x32xf32> to vector<2x8x32xf32>
    %c0_10 = arith.constant 0 : index
    %c0_11 = arith.constant 0 : index
    %13 = vector.load %arg9[%c0_10, %c0_11] : memref<32x32xbf16, #tpu.memory_space<vmem>>, vector<32x32xbf16>
    %cst_12 = arith.constant dense<0.000000e+00> : vector<16x32xf32>
    %14 = tpu.matmul %6, %13, %cst_12 {dimension_numbers = #tpu.dot_dimension_numbers<[1], [0], [0], [1], [0, 0, 1, 1], [], []>} : vector<16x32xbf16>, vector<32x32xbf16>, vector<16x32xf32> -> vector<16x32xf32>
    %c0_13 = arith.constant 0 : index
    %c0_14 = arith.constant 0 : index
    %15 = vector.load %arg10[%c0_13, %c0_14] : memref<1x32xf32, #tpu.memory_space<vmem>>, vector<1x32xf32>
    %16 = vector.broadcast %15 : vector<1x32xf32> to vector<16x32xf32>
    %17 = arith.addf %14, %16 : vector<16x32xf32>
    %18 = vector.shape_cast %17 : vector<16x32xf32> to vector<2x8x32xf32>
    %c0_15 = arith.constant 0 : index
    %c0_16 = arith.constant 0 : index
    %c0_17 = arith.constant 0 : index
    %19 = vector.load %arg13[%c0_15, %c0_16, %c0_17] : memref<2x8x32xbf16, #tpu.memory_space<vmem>>, vector<2x8x32xbf16>
    %20 = arith.truncf %12 : vector<2x8x32xf32> to vector<2x8x32xbf16>
    "tpu.trace_start"() <{level = 10 : i32, message = "bkh,bsh->bks"}> : () -> ()
    %cst_18 = arith.constant dense<0.000000e+00> : vector<2x8x8xf32>
    %21 = tpu.matmul %19, %20, %cst_18 {dimension_numbers = #tpu.dot_dimension_numbers<[2], [2], [1], [1], [0, 0, 0, 1, 1, 1], [0], [0]>} : vector<2x8x32xbf16>, vector<2x8x32xbf16>, vector<2x8x8xf32> -> vector<2x8x8xf32>
    "tpu.trace_stop"() : () -> ()
    %cst_19 = arith.constant dense<0xFF800000> : vector<2x8xf32>
    %22 = vector.multi_reduction <maximumf>, %21, %cst_19 [1] : vector<2x8x8xf32> to vector<2x8xf32>
    %23 = vector.shape_cast %22 : vector<2x8xf32> to vector<2x1x8xf32>
    %24 = vector.broadcast %23 : vector<2x1x8xf32> to vector<2x8x8xf32>
    %25 = arith.subf %21, %24 : vector<2x8x8xf32>
    %26 = math.exp %25 : vector<2x8x8xf32>
    %cst_20 = arith.constant dense<0.000000e+00> : vector<2x8xf32>
    %27 = vector.multi_reduction <add>, %26, %cst_20 [1] : vector<2x8x8xf32> to vector<2x8xf32>
    %28 = vector.shape_cast %27 : vector<2x8xf32> to vector<2x1x8xf32>
    %29 = tpu.reciprocal %28 {approx = true} : vector<2x1x8xf32> -> vector<2x1x8xf32>
    %30 = vector.broadcast %29 : vector<2x1x8xf32> to vector<2x8x8xf32>
    %31 = arith.mulf %26, %30 : vector<2x8x8xf32>
    %c0_21 = arith.constant 0 : index
    %c0_22 = arith.constant 0 : index
    %c0_23 = arith.constant 0 : index
    %32 = vector.load %arg12[%c0_21, %c0_22, %c0_23] : memref<2x8x8xf32, #tpu.memory_space<vmem>>, vector<2x8x8xf32>
    tpu.vector_store %arg12[%c0_21, %c0_22, %c0_23], %31 {strides = array<i32>} : memref<2x8x8xf32, #tpu.memory_space<vmem>>, vector<2x8x8xf32>,
    %c0_24 = arith.constant 0 : index
    %c0_25 = arith.constant 0 : index
    %c0_26 = arith.constant 0 : index
    %33 = vector.load %arg14[%c0_24, %c0_25, %c0_26] : memref<2x8x32xf32, #tpu.memory_space<vmem>>, vector<2x8x32xf32>
    %34 = arith.truncf %31 : vector<2x8x8xf32> to vector<2x8x8xbf16>
    %35 = arith.truncf %18 : vector<2x8x32xf32> to vector<2x8x32xbf16>
    "tpu.trace_start"() <{level = 10 : i32, message = "bks,bsh->bkh"}> : () -> ()
    %cst_27 = arith.constant dense<0.000000e+00> : vector<2x8x32xf32>
    %36 = tpu.matmul %34, %35, %cst_27 {dimension_numbers = #tpu.dot_dimension_numbers<[2], [1], [1], [2], [0, 0, 0, 1, 1, 2], [0], [0]>} : vector<2x8x8xbf16>, vector<2x8x32xbf16>, vector<2x8x32xf32> -> vector<2x8x32xf32>
    "tpu.trace_stop"() : () -> ()
    %37 = arith.addf %33, %36 : vector<2x8x32xf32>
    %c0_28 = arith.constant 0 : index
    %c0_29 = arith.constant 0 : index
    %c0_30 = arith.constant 0 : index
    %38 = vector.load %arg14[%c0_28, %c0_29, %c0_30] : memref<2x8x32xf32, #tpu.memory_space<vmem>>, vector<2x8x32xf32>
    tpu.vector_store %arg14[%c0_28, %c0_29, %c0_30], %37 {strides = array<i32>} : memref<2x8x32xf32, #tpu.memory_space<vmem>>, vector<2x8x32xf32>,
    %c0_i32_31 = arith.constant 0 : i32
    %39 = arith.cmpi eq, %arg1, %c0_i32_31 : i32
    %40 = arith.extui %39 : i1 to i32
    %c0_i32_32 = arith.constant 0 : i32
    %41 = arith.cmpi ne, %40, %c0_i32_32 : i32
    scf.if %41 {
      %c0_33 = arith.constant 0 : index
      %c0_34 = arith.constant 0 : index
      %c0_35 = arith.constant 0 : index
      %42 = vector.load %arg14[%c0_33, %c0_34, %c0_35] : memref<2x8x32xf32, #tpu.memory_space<vmem>>, vector<2x8x32xf32>
      %c0_36 = arith.constant 0 : index
      %c0_37 = arith.constant 0 : index
      %c0_38 = arith.constant 0 : index
      %43 = vector.load %arg11[%c0_36, %c0_37, %c0_38] : memref<2x8x32xf32, #tpu.memory_space<vmem>>, vector<2x8x32xf32>
      tpu.vector_store %arg11[%c0_36, %c0_37, %c0_38], %42 {strides = array<i32>} : memref<2x8x32xf32, #tpu.memory_space<vmem>>, vector<2x8x32xf32>,
    } else {
    }
    return
  }
  func.func @transform_0(%arg0: i32, %arg1: i32) -> (i32, i32, i32) {
    %c0_i32 = arith.constant 0 : i32
    %c0_i32_0 = arith.constant 0 : i32
    %c0_i32_1 = arith.constant 0 : i32
    return %arg0, %c0_i32, %c0_i32_0 : i32, i32, i32
  }
  func.func @transform_1(%arg0: i32, %arg1: i32) -> (i32, i32, i32) {
    %c0_i32 = arith.constant 0 : i32
    %c0_i32_0 = arith.constant 0 : i32
    return %arg0, %arg1, %c0_i32 : i32, i32, i32
  }
  func.func @transform_2(%arg0: i32, %arg1: i32) -> (i32, i32, i32) {
    %c0_i32 = arith.constant 0 : i32
    %c0_i32_0 = arith.constant 0 : i32
    return %arg0, %arg1, %c0_i32 : i32, i32, i32
  }
  func.func @transform_3(%arg0: i32, %arg1: i32) -> (i32, i32) {
    %c0_i32 = arith.constant 0 : i32
    %c0_i32_0 = arith.constant 0 : i32
    %c0_i32_1 = arith.constant 0 : i32
    return %c0_i32, %c0_i32_0 : i32, i32
  }
  func.func @transform_4(%arg0: i32, %arg1: i32) -> (i32, i32) {
    %c0_i32 = arith.constant 0 : i32
    %c0_i32_0 = arith.constant 0 : i32
    %c0_i32_1 = arith.constant 0 : i32
    return %c0_i32, %c0_i32_0 : i32, i32
  }
  func.func @transform_5(%arg0: i32, %arg1: i32) -> (i32, i32) {
    %c0_i32 = arith.constant 0 : i32
    %c0_i32_0 = arith.constant 0 : i32
    %c0_i32_1 = arith.constant 0 : i32
    return %c0_i32, %c0_i32_0 : i32, i32
  }
  func.func @transform_6(%arg0: i32, %arg1: i32) -> (i32, i32) {
    %c0_i32 = arith.constant 0 : i32
    %c0_i32_0 = arith.constant 0 : i32
    %c0_i32_1 = arith.constant 0 : i32
    return %c0_i32, %c0_i32_0 : i32, i32
  }
  func.func @transform_7(%arg0: i32, %arg1: i32) -> (i32, i32) {
    %c0_i32 = arith.constant 0 : i32
    %c0_i32_0 = arith.constant 0 : i32
    %c0_i32_1 = arith.constant 0 : i32
    return %c0_i32, %c0_i32_0 : i32, i32
  }
  func.func @transform_8(%arg0: i32, %arg1: i32) -> (i32, i32) {
    %c0_i32 = arith.constant 0 : i32
    %c0_i32_0 = arith.constant 0 : i32
    %c0_i32_1 = arith.constant 0 : i32
    return %c0_i32, %c0_i32_0 : i32, i32
  }
  func.func @transform_9(%arg0: i32, %arg1: i32) -> (i32, i32, i32) {
    %c0_i32 = arith.constant 0 : i32
    %c0_i32_0 = arith.constant 0 : i32
    %c0_i32_1 = arith.constant 0 : i32
    return %arg0, %c0_i32, %c0_i32_0 : i32, i32, i32
  }
  func.func @transform_10(%arg0: i32, %arg1: i32) -> (i32, i32, i32) {
    %c0_i32 = arith.constant 0 : i32
    %c0_i32_0 = arith.constant 0 : i32
    return %arg0, %c0_i32, %arg1 : i32, i32, i32
  }
}

</mosaic_0001>

<bundles_post_ra>
// kernel: tpu_custom_call.1
= control target key start
LH: loop header
LB: loop body
LE: loop exit
PB: predicated region body
PF: predicated region fallthrough
CT: control target
= control target key end

     0   :  { %s2259_s0 = inlined_call_operand.hbm [shape: bf16[8,8,32], index: 0, kind: input, shape index: {}]   ;;  %s2260_s1 = inlined_call_operand.hbm [shape: bf16[8,8,32], index: 1, kind: input, shape index: {}]   ;;  %s2261_s2 = inlined_call_operand.hbm [shape: bf16[8,8,32], index: 2, kind: input, shape index: {}]   ;;  %s2262_s3 = inlined_call_operand.hbm [shape: bf16[32,32], index: 3, kind: input, shape index: {}]   ;;  %s2263_s4 = inlined_call_operand.vmem [shape: f32[1,32], index: 4, kind: input, shape index: {}]   ;;  %s2264_s5 = inlined_call_operand.vmem [shape: bf16[32,32], index: 5, kind: input, shape index: {}]   ;;  %s2265_s6 = inlined_call_operand.vmem [shape: f32[1,32], index: 6, kind: input, shape index: {}]   ;;  %s2266_s7 = inlined_call_operand.hbm [shape: bf16[32,32], index: 7, kind: input, shape index: {}]   ;;  %s2267_s8 = inlined_call_operand.vmem [shape: f32[1,32], index: 8, kind: input, shape index: {}]   ;;  %s2268_s9 = inlined_call_operand.hbm [shape: f32[8,8,32], index: 9, kind: output, shape index: {0}]   ;;  %s2269_s10 = inlined_call_operand.hbm [shape: f32[8,8,8], index: 10, kind: output, shape index: {1}]  }
   0x1   :  { %2297 = sst [smem:[#allocation29_spill]] %s2260_s1 }
   0x2   :  { %2298 = sst [smem:[#allocation30_spill]] %s2262_s3 }
   0x3   :  { %2299 = sst [smem:[#allocation31_spill]] %s2266_s7 }
   0x4   :  { %2300 = sst [smem:[#allocation32_spill]] %s2268_s9 }
   0x5   :  { %2301 = sst [smem:[#allocation33_spill]] %s2269_s10 }
   0x6   :  { %16 = vsyncpa [#allocation5], 0 }
   0x7   :  { %18 = vsyncpa [#allocation5 + $0x1], 0 }
   0x8   :  { %19 = vsyncpa [#allocation8], 0 }
   0x9   :  { %21 = vsyncpa [#allocation8 + $0x1], 0 }
   0xa   :  { %22 = vsyncpa [#allocation11], 0 }
   0xb   :  { %23 = vsyncpa [#allocation6], 0 }
   0xc   :  { %25 = vsyncpa [#allocation6 + $0x1], 0 }
   0xd   :  { %26 = vsyncpa [#allocation15], 0 }
   0xe   :  { %28 = vsyncpa [#allocation15 + $0x1], 0  ;;  %s1799_s13 = smov 0   ;;  %s1801_s14 = smov 0  }
   0xf   :  { %s1803_s15 = smov 0   ;;  %s1805_s16 = smov 0  }
  0x10   :  { %s1807_s17 = smov 0   ;;  %s1809_s18 = smov 0  }
  0x11 LB: > { %2302 = sst [smem:[#allocation21_spill]] %s1709_s13  ;;  %s1830_s19 = sadd.s32 4294967295, %s1729_s18   ;;  %s1729_s18 = sphi %s1809_s18, %s34_s18   ;;  %s1725_s17 = sphi %s1807_s17, %s2349_s17   ;;  %s1721_s16 = sphi %s1805_s16, %s2348_s16   ;;  %s1717_s15 = sphi %s1803_s15, %s2352_s15   ;;  %s1713_s14 = sphi %s1801_s14, %s2351_s14   ;;  %s1709_s13 = sphi %s1799_s13, %s2350_s13  }
  0x12   : > { %2303 = sst [smem:[#allocation22_spill]] %s1721_s16  ;;  %s1221_s20 = sadd.s32 4294967294, %s1729_s18  }
  0x13   : > { %2304 = sst [smem:[#allocation23_spill]] %s1725_s17  ;;  %p60_p0 = scmp.ne.s32.totalorder %s1717_s15, %s1713_s14 }
  0x14   : > { %2305 = sst [smem:[#allocation24_spill]] %s1729_s18  ;;  %p61_p1 = scmp.eq.s32.totalorder %s1729_s18, 0 }
  0x15   : > { %p66_p2 = scmp.ne.s32.totalorder %s1713_s14, %s1709_s13  ;;  %p2274_p3 = scmp.eq.s32.totalorder %s1830_s19, 0 }
  0x16   : > { %p1839_p4 = por %p61_p1, %p60_p0  ;;  %p272_p5 = scmp.eq.s32.totalorder %s1830_s19, 3 }
  0x17   : > { %p1846_p6 = por %p2274_p3, %p66_p2  ;;  %p278_p7 = scmp.eq.s32.totalorder %s1221_s20, 3 }
  0x18   : > { %s2306_s21 = scalar_select %p1839_p4, 1, 0 }
  0x19   : > { %s2307_s22 = scalar_select %p1846_p6, 1, 0 }
  0x1a   : > { %p1850_p8 = por %p272_p5, %p60_p0  ;;  %p1222_p9 = scmp.ge.s32.totalorder %s1729_s18, 1 }
  0x1b   : > { %p1855_p10 = por %p278_p7, %p66_p2  ;;  %p313_p11 = scmp.lt.s32.totalorder %s1729_s18, 5 }
  0x1c   : > { %s2308_s23 = scalar_select %p1850_p8, 1, 0 }
  0x1d   : > { %s2310_s24 = scalar_select %p1855_p10, 1, 0 }
  0x1e   : > { %2309 = sst [smem:[#allocation25_spill]] %s2308_s23  ;;  %p1860_p12 = pnand %p1222_p9, %p313_p11 }
  0x1f   : > { %2311 = sst [smem:[#allocation26_spill]] %s2310_s24  ;;  %s1731_s26 = smov [#allocation10]  }
  0x20   : > { %s2312_s25 = scalar_select %p1860_p12, 1, 0 }
  0x21   : > { %s325_s27 = sshll.u32 %s1731_s26, 4  ;;  %p1358_p13 = pneg %p1860_p12  ;;  %s326_s27 = int_to_ptr.vmem [resolvable:$true] %s325_s27 }
  0x22   : > { %s46_s29 = sadd.s32 1, %s1725_s17  ;;  %s2315_s3 = sld [smem:[#allocation30_spill]] }
  0x23   : > { %p1868_p0 = pnand %p1358_p13, %p2274_p3  ;;  %p1874_p1 = scmp.ge.s32.totalorder %s46_s29, 4 }
  0x25   : > { %s2313_s28 = scalar_select %p1868_p0, 1, 0 }
  0x26   : > { %s2314_s11 = scalar_select %p1874_p1, 1, 0 }
  0x27   : > { %p2287_p5 = pneg %p1868_p0 }
  0x28   : > { %s1461_s26 = scalar_lea.hbm %s2315_s3, 256 }
  0x29   : > { %p1462_p2 = scmp.ne.s32.totalorder %s2315_s3, %s1461_s26  ;;  %p1468_p11 = scmp.lt.u32.totalorder %s1461_s26, %s2315_s3 }
  0x2b   : > { %p1464_p7 = pnand %p2287_p5, %p1462_p2 }
  0x2d   : > { %p1465_p9 = pneg %p1464_p7 }
  0x2f   : > { %p1470_p13 = pnand %p1468_p11, %p1465_p9 }
  0x31   : > { %1473 = shalt.err (!%p1470_p13)
}
  0x32   : > { %s1474_s10 = scalar_lea.vmem %s326_s27, 256  ;;  %p1482_p6 = scmp.lt.s32.totalorder %s326_s27, %s326_s27 }
  0x33   : > { %p1475_p3 = scmp.ne.s32.totalorder %s326_s27, %s1474_s10  ;;  %p1483_p12 = scmp.lt.s32.totalorder %s1474_s10, %s1474_s10 }
  0x35   : > { %p1477_p10 = pnand %p1475_p3, %p2287_p5  ;;  %p1484_p4 = por %p1483_p12, %p1482_p6 }
  0x37   : > { %p1478_p8 = pneg %p1477_p10 }
  0x39   : > { %p1485_p1 = pnand %p1484_p4, %p1478_p8 }
  0x3b   : > { %1488 = shalt.err (!%p1485_p1)
}
  0x3c   : > { %s2280_s13 = smov 64   ;;  %s2283_s9 = smov 4  }
  0x3d   : > { %1361 = dma.hbm_to_vmem [thread:$0]  (!%p1868_p0), %s2315_s3, 256, %s326_s27, [#allocation11], %s2280_s13, %s2280_s13, %s2283_s9  }
  0x3e   : > { %p2316_p3 = scmp.ne.s32.totalorder %s2314_s11, 0  ;;  %p1384_p4 = scmp.lt.s32.totalorder %s1729_s18, 4 }
  0x3f   : > { %s2282_s30 = sand.u32 1, %s1717_s15   ;;  %s1916_s26 = sshll.u32 %s1725_s17, 7 }
  0x40   : > { %s2354_s29 = smov (%p2316_p3, %s46_s29), 0  ;;  %s1913_s20 = sshll.u32 %s2282_s30, 3 }
  0x41   : > { %2317 = sst [smem:[#allocation27_spill]] %s2354_s29  ;;  %s50_s12 = ssub.s32 %s1725_s17, %s2354_s29 }
  0x42   : > { %p51_p6 = scmp.eq.s32.totalorder %s50_s12, 0  ;;  %p2318_p8 = scmp.ne.s32.totalorder %s2306_s21, 0 }
  0x43   : > { %s385_s27 = sand.u32 1, %s1729_s18   ;;  %s2320_s11 = sadd.s32 1, %s1717_s15 }
  0x44   : > { %p1920_p10 = pnand %p1384_p4, %p2318_p8  ;;  %s2322_s1 = sld [smem:[#allocation29_spill]] }
  0x45   : > { %s1928_s10 = scalar_select %p51_p6, %s1717_s15, %s2320_s11  }
  0x46   : > { %s2319_s23 = scalar_select %p1920_p10, 1, 0 }
  0x47   : > { %2321 = sst [smem:[#allocation28_spill]] %s1928_s10  ;;  %s389_s21 = scalar_lea.vmem [#allocation7], %s1913_s20 }
  0x48   : > { %s397_s12 = sshll.u32 %s389_s21, 4  ;;  %s1734_s9 = smov [#allocation12]   ;;  %s1937_s12 = int_to_ptr.vmem [resolvable:$true] %s397_s12 }
  0x49   : > { %s1939_s3 = sshll.u32 %s1734_s9, 4  ;;  %s1941_s29 = scalar_lea.sflag [#allocation8], %s385_s27  ;;  %s348_s3 = int_to_ptr.vmem [resolvable:$true] %s1939_s3 }
  0x4a   : > { %s1934_s30 = scalar_lea.hbm %s2322_s1, %s1916_s26  ;;  %p1947_p1 = pneg %p1920_p10 }
  0x4b   : > { %s1489_s11 = scalar_lea.hbm %s1934_s30, 128  ;;  %s1494_s17 = scalar_lea.hbm %s2322_s1, 512 }
  0x4c   : > { %p1490_p12 = scmp.ne.s32.totalorder %s1934_s30, %s1489_s11  ;;  %p1495_p9 = scmp.lt.u32.totalorder %s1934_s30, %s2322_s1 }
  0x4d   : > { %s2323_s13 = scalar_select %p1947_p1, 1, 0 }
  0x4e   : > { %p1492_p2 = pnand %p1947_p1, %p1490_p12  ;;  %p1496_p11 = scmp.lt.u32.totalorder %s1494_s17, %s1489_s11 }
  0x4f   : > { %p1498_p3 = scmp.lt.u32.totalorder %s1489_s11, %s1934_s30 }
  0x50   : > { %p1493_p7 = pneg %p1492_p2  ;;  %p1497_p13 = por %p1496_p11, %p1495_p9 }
  0x52   : > { %p1499_p4 = por %p1498_p3, %p1497_p13 }
  0x54   : > { %p1500_p6 = pnand %p1499_p4, %p1493_p7 }
  0x56   : > { %1503 = shalt.err (!%p1500_p6)
}
  0x57   : > { %s1504_s27 = scalar_lea.vmem %s1937_s12, 128  ;;  %s1735_s24 = smov [#allocation7]  }
  0x58   : > { %p1505_p8 = scmp.ne.s32.totalorder %s1937_s12, %s1504_s27  ;;  %s1509_s21 = sshll.u32 %s1735_s24, 4  ;;  %s1510_s21 = int_to_ptr.vmem [resolvable:$false] %s1509_s21 }
  0x59   : > { %s1511_s10 = scalar_lea.vmem %s1510_s21, 256  ;;  %p1512_p5 = scmp.lt.s32.totalorder %s1937_s12, %s1510_s21 }
  0x5a   : > { %p1507_p12 = pnand %p1505_p8, %p1947_p1  ;;  %p1513_p0 = scmp.lt.s32.totalorder %s1511_s10, %s1504_s27 }
  0x5c   : > { %p1508_p2 = pneg %p1507_p12  ;;  %p1514_p9 = por %p1513_p0, %p1512_p5 }
  0x5e   : > { %p1515_p11 = pnand %p1514_p9, %p1508_p2 }
  0x60   : > { %1518 = shalt.err (!%p1515_p11)
}
  0x61   : > { %s2324_s17 = smov 4   ;;  %s2325_s11 = smov 64  }
  0x62   : > { %1371 = dma.hbm_to_vmem [thread:$0]  (!%p1920_p10), %s1934_s30, 128, %s1937_s12, %s1941_s29, %s2325_s11, %s2325_s11, %s2324_s17  }
  0x63   : > { %s2326_s7 = sld [smem:[#allocation31_spill]]  ;;  %p2327_p5 = scmp.ne.s32.totalorder %s2313_s28, 0 }
  0x65   : > { %p2328_p7 = pneg %p2327_p5 }
  0x69   : > { %s1519_s21 = scalar_lea.hbm %s2326_s7, 256 }
  0x6a   : > { %p1520_p0 = scmp.ne.s32.totalorder %s2326_s7, %s1519_s21  ;;  %p1526_p4 = scmp.lt.u32.totalorder %s1519_s21, %s2326_s7 }
  0x6c   : > { %p1522_p13 = pnand %p1520_p0, %p2328_p7 }
  0x6e   : > { %p1523_p3 = pneg %p1522_p13 }
  0x70   : > { %p1528_p6 = pnand %p1526_p4, %p1523_p3 }
  0x72   : > { %1531 = shalt.err (!%p1528_p6)
}
  0x73   : > { %s1532_s30 = scalar_lea.vmem %s348_s3, 256  ;;  %p2329_p12 = pmov %p2328_p7 }
  0x74   : > { %p1533_p8 = scmp.ne.s32.totalorder %s348_s3, %s1532_s30  ;;  %p1540_p11 = scmp.lt.s32.totalorder %s348_s3, %s348_s3 }
  0x75   : > { %p1541_p10 = scmp.lt.s32.totalorder %s1532_s30, %s1532_s30 }
  0x76   : > { %p1535_p2 = pnand %p1533_p8, %p2329_p12 }
  0x77   : > { %p1542_p1 = por %p1541_p10, %p1540_p11 }
  0x78   : > { %p1536_p9 = pneg %p1535_p2 }
  0x7a   : > { %p1543_p0 = pnand %p1542_p1, %p1536_p9 }
  0x7c   : > { %1546 = shalt.err (!%p1543_p0)
}
  0x7d   : > { %1364 = dma.hbm_to_vmem [thread:$0]  (!%p2327_p5), %s2326_s7, 256, %s348_s3, [#allocation11], %s2325_s11, %s2325_s11, %s2324_s17  }
  0x7e   : > { %s2002_s24 = scalar_lea.hbm %s2259_s0, %s1916_s26  ;;  %s368_s28 = scalar_lea.vmem [#allocation4], %s1913_s20 }
  0x7f   : > { %s375_s21 = sshll.u32 %s368_s28, 4  ;;  %s2011_s30 = scalar_lea.hbm %s2261_s2, %s1916_s26  ;;  %s2005_s21 = int_to_ptr.vmem [resolvable:$true] %s375_s21 }
  0x80   : > { %s2330_s1 = sand.u32 1, %s1717_s15   ;;  %s1547_s18 = scalar_lea.hbm %s2002_s24, 128 }
  0x81   : > { %s2015_s3 = scalar_lea.sflag [#allocation5], %s2330_s1  ;;  %p1548_p10 = scmp.ne.s32.totalorder %s2002_s24, %s1547_s18 }
  0x82   : > { %p2331_p1 = scmp.ne.s32.totalorder %s2323_s13, 0  ;;  %s1552_s7 = scalar_lea.hbm %s2259_s0, 512 }
  0x83   : > { %p1553_p13 = scmp.lt.u32.totalorder %s2002_s24, %s2259_s0  ;;  %p1554_p3 = scmp.lt.u32.totalorder %s1552_s7, %s1547_s18 }
  0x84   : > { %p1550_p5 = pnand %p1548_p10, %p2331_p1  ;;  %p1556_p6 = scmp.lt.u32.totalorder %s1547_s18, %s2002_s24 }
  0x85   : > { %p1555_p4 = por %p1554_p3, %p1553_p13 }
  0x86   : > { %p1551_p7 = pneg %p1550_p5 }
  0x87   : > { %p1557_p8 = por %p1556_p6, %p1555_p4 }
  0x89   : > { %p1558_p12 = pnand %p1557_p8, %p1551_p7 }
  0x8b   : > { %1561 = shalt.err (!%p1558_p12)
}
  0x8c   : > { %s1562_s26 = scalar_lea.vmem %s2005_s21, 128  ;;  %s1736_s27 = smov [#allocation4]  }
  0x8d   : > { %p1563_p2 = scmp.ne.s32.totalorder %s2005_s21, %s1562_s26  ;;  %s1567_s10 = sshll.u32 %s1736_s27, 4  ;;  %s1568_s10 = int_to_ptr.vmem [resolvable:$false] %s1567_s10 }
  0x8e   : > { %s1569_s16 = scalar_lea.vmem %s1568_s10, 256  ;;  %p1570_p0 = scmp.lt.s32.totalorder %s2005_s21, %s1568_s10 }
  0x8f   : > { %p1565_p9 = pnand %p1563_p2, %p2331_p1  ;;  %p1571_p10 = scmp.lt.s32.totalorder %s1569_s16, %s1562_s26 }
  0x91   : > { %p1566_p11 = pneg %p1565_p9  ;;  %p1572_p5 = por %p1571_p10, %p1570_p0 }
  0x93   : > { %p1573_p13 = pnand %p1572_p5, %p1566_p11 }
  0x95   : > { %1576 = shalt.err (!%p1573_p13)
}
  0x96   : > { %p2332_p7 = scmp.ne.s32.totalorder %s2319_s23, 0  ;;  %s411_s7 = scalar_lea.vmem [#allocation9], %s1913_s20 }
  0x97   : > { %s419_s1 = sshll.u32 %s411_s7, 4  ;;  %s1577_s18 = scalar_lea.hbm %s2011_s30, 128  ;;  %s2043_s1 = int_to_ptr.vmem [resolvable:$true] %s419_s1 }
  0x98   : > { %1368 = dma.hbm_to_vmem [thread:$0]  (!%p2332_p7), %s2002_s24, 128, %s2005_s21, %s2015_s3, %s2325_s11, %s2325_s11, %s2324_s17  }
  0x99   : > { %p1578_p3 = scmp.ne.s32.totalorder %s2011_s30, %s1577_s18  ;;  %s1582_s28 = scalar_lea.hbm %s2261_s2, 512 }
  0x9a   : > { %p1583_p8 = scmp.lt.u32.totalorder %s2011_s30, %s2261_s2  ;;  %p1584_p12 = scmp.lt.u32.totalorder %s1582_s28, %s1577_s18 }
  0x9b   : > { %p1580_p4 = pnand %p1578_p3, %p2331_p1  ;;  %p1586_p9 = scmp.lt.u32.totalorder %s1577_s18, %s2011_s30 }
  0x9c   : > { %p1585_p2 = por %p1584_p12, %p1583_p8 }
  0x9d   : > { %p1581_p6 = pneg %p1580_p4 }
  0x9e   : > { %p1587_p11 = por %p1586_p9, %p1585_p2 }
  0xa0   : > { %p1588_p0 = pnand %p1587_p11, %p1581_p6 }
  0xa2   : > { %1591 = shalt.err (!%p1588_p0)
}
  0xa3   : > { %s1592_s20 = scalar_lea.vmem %s2043_s1, 128  ;;  %s1737_s24 = smov [#allocation9]  }
  0xa4   : > { %p1593_p10 = scmp.ne.s32.totalorder %s2043_s1, %s1592_s20  ;;  %s1597_s21 = sshll.u32 %s1737_s24, 4  ;;  %s1598_s21 = int_to_ptr.vmem [resolvable:$false] %s1597_s21 }
  0xa5   : > { %s1599_s3 = scalar_lea.vmem %s1598_s21, 256  ;;  %p1600_p3 = scmp.lt.s32.totalorder %s2043_s1, %s1598_s21 }
  0xa6   : > { %p1595_p5 = pnand %p1593_p10, %p2331_p1  ;;  %p1601_p4 = scmp.lt.s32.totalorder %s1599_s3, %s1592_s20 }
  0xa8   : > { %p1596_p13 = pneg %p1595_p5  ;;  %p1602_p8 = por %p1601_p4, %p1600_p3 }
  0xaa   : > { %p1603_p12 = pnand %p1602_p8, %p1596_p13 }
  0xac   : > { %1606 = shalt.err (!%p1603_p12)
}
  0xad   : > { %1374 = dma.hbm_to_vmem [thread:$0]  (!%p2332_p7), %s2011_s30, 128, %s2043_s1, %s1941_s29, %s2325_s11, %s2325_s11, %s2324_s17  }
  0xae   : > { %p2333_p1 = scmp.ne.s32.totalorder %s2312_s25, 0 }
  0xaf   : > { %s2073_s13 = sand.u32 (!%p2333_p1), 1, %s1713_s14   ;;  %p2334_p6 = scmp.ne.s32.totalorder (!%p2333_p1), %s2307_s22, 0 }
  0xb0   : > { %431 = sbr.rel (%p2333_p1) target bundleno = 930 (0x3a2), region = 56  ;;  %s2076_s10 = sshll.u32 (!%p2333_p1), %s2073_s13, 3 }
  0xb1   : > { %s434_s23 = scalar_lea.sflag (!%p2333_p1), [#allocation5], %s2073_s13  ;;  %s437_s16 = scalar_lea.vmem (!%p2333_p1), [#allocation4], %s2076_s10 }
  0xb7   : > { %1688 = dma.done.wait (%p2334_p6), %s434_s23, 128  }
  0xb8   : > { %1690 = vsyncadd (%p2334_p6), %s434_s23, 4294967168  ;;  %s442_s25 = sand.u32 1, %s1830_s19   ;;  %s446_s17 = scalar_lea.vmem [#allocation7], %s2076_s10 }
  0xb9   : > { %s443_s29 = scalar_lea.sflag [#allocation8], %s442_s25 }
  0xba   : > { %1692 = dma.done.wait (%p2334_p6), %s443_s29, 256  }
  0xbb   : > { %1694 = vsyncadd (%p2334_p6), %s443_s29, 4294967040  ;;  %s455_s11 = scalar_lea.vmem [#allocation9], %s2076_s10  ;;  %p2335_p7 = scmp.eq.s32.totalorder %s1830_s19, 0 }
  0xbd   : > { %1696 = dma.done.wait (%p2335_p7), [#allocation11], 512   ;;  %p2336_p2 = pmov %p2335_p7 }
  0xbe   : > { %vm555_vm0 = vcmask 261120   ;;  %v1738_v0 = vmov 0.0   ;;  %vm1739_vm1 = vmmov 0   ;;  %v1444_v1 = vld [vmem:[#allocation10] sm:$0xff]   ;;  %v1445_v2 = vld [vmem:[%s2264_s5] sm:$0xff]   ;;  %v1446_v3 = vld [vmem:[#allocation10 + $0x8] sm:$0xff]  }
  0xbf   : > { %1698 = vsyncadd (%p2336_p2), [#allocation11], 4294966784  ;;  %1292 = vmatprep.subr.bf16.mxu0 %v1738_v0  ;;  %1300 = vmatprep.subr.bf16.mxu1 %v1738_v0  ;;  %605 = vst.msk [vmem:[#allocation3] sm:$0xff] %vm555_vm0, %v1738_v0  ;;  %v1447_v4 = vld [vmem:[%s2264_s5 + $0x8] sm:$0xff]   ;;  %v1448_v5 = vld [vmem:[%s437_s16] sm:$0xff]   ;;  %vm602_vm2 = vcmask 257024  }
  0xc0   : > { %606 = vst.msk [vmem:[#allocation3 + $0x8] sm:$0xff] %vm555_vm0, %v1738_v0  ;;  %1296 = vmatprep.mubr.msk.bf16.mxu0 %vm1739_vm1, %v1738_v0  ;;  %1304 = vmatprep.mubr.msk.bf16.mxu1 %vm1739_vm1, %v1738_v0  ;;  %v1449_v6 = vld [vmem:[%s446_s17] sm:$0xff]   ;;  %v1450_v7 = vld [vmem:[#allocation12] sm:$0xff]   ;;  %v1451_v8 = vld [vmem:[#allocation12 + $0x8] sm:$0xff]   ;;  %vm902_vm3 = vcmask 1043456   ;;  %vm852_vm4 = vcmask 64512  }
  0xc1   : > { %1293 = vmatpush3.bf16.msra.mxu0 %v1444_v1  ;;  %1301 = vmatpush3.bf16.msra.mxu1 %v1445_v2  ;;  %v1452_v9 = vld [vmem:[%s455_s11] sm:$0xff]   ;;  %s2337_s27 = sld [smem:[#allocation22_spill]]  ;;  %s1241_s20 = sshll.u32 %s2073_s13, 4 }
  0xc2   : > { %1294 = vmatprep.subr.bf16.mxu0 %v1738_v0  ;;  %1302 = vmatprep.subr.bf16.mxu1 %v1738_v0  ;;  %v1243_v10 = vld [vmem:[%s2263_s4] ss:$0 sm:$0xff]  ;;  %s2338_s24 = sld [smem:[#allocation25_spill]]  ;;  %s514_s21 = scalar_lea.vmem [#allocation14], %s1241_s20 }
  0xc3   : > { %v1248_v11 = vld [vmem:[%s2265_s6] ss:$0 sm:$0xff]  ;;  %s2339_s16 = sld [smem:[#allocation33_spill]]  ;;  %s1039_s17 = sshll.u32 %s514_s21, 4  ;;  %s2166_s17 = int_to_ptr.vmem [resolvable:$true] %s1039_s17 }
  0xc4   : > { %v1253_v32 = vld [vmem:[%s2267_s8] ss:$0 sm:$0xff]  ;;  %s1009_s11 = scalar_lea.sflag [#allocation15], %s2073_s13  ;;  %s1607_s19 = scalar_lea.vmem %s2166_s17, 256 }
  0xc5   : > { %1295 = vmatpush3.bf16.msra.mxu0 %v1446_v3  ;;  %1303 = vmatpush3.bf16.msra.mxu1 %v1447_v4  ;;  %p1608_p9 = scmp.ne.s32.totalorder %s2166_s17, %s1607_s19  ;;  %s1740_s22 = smov [#allocation14]  }
  0xc6   : > { %1308 = vmatprep.subr.bf16.mxu0 %v1738_v0  ;;  %1316 = vmatprep.subr.bf16.mxu1 %v1738_v0  ;;  %s1611_s30 = sshll.u32 %s1740_s22, 4  ;;  %s1612_s30 = int_to_ptr.vmem [resolvable:$false] %s1611_s30 }
  0xc7   : > { %s1273_s3 = sshll.u32 %s2337_s27, 8  ;;  %s1613_s7 = scalar_lea.vmem %s1612_s30, 512 }
  0xc8   : > { %1297 = vmatmul.mubr.msk.bf16.vlgmr.msra.gmra.mrb[0].mxu0 %vm555_vm0, %v1448_v5  ;;  %1305 = vmatmul.mubr.msk.bf16.vlgmr.msra.gmra.mrb[0].mxu1 %vm555_vm0, %v1449_v6  ;;  %p2341_p11 = scmp.ne.s32.totalorder %s2338_s24, 0  ;;  %p1614_p5 = scmp.lt.s32.totalorder %s2166_s17, %s1612_s30 }
  0xc9   : > { %1309 = vmatpush3.bf16.msra.mxu0 %v1450_v7  ;;  %1312 = vmatprep.mubr.msk.bf16.mxu0 %vm1739_vm1, %v1738_v0  ;;  %s2340_s25 = smov %s2339_s16  ;;  %s2164_s29 = scalar_lea.hbm %s2339_s16, %s1273_s3 }
  0xca   : > { %1310 = vmatprep.subr.bf16.mxu0 %v1738_v0  ;;  %1318 = vmatprep.mubr.msk.bf16.mxu1 %vm1739_vm1, %v1738_v0  ;;  %p1609_p0 = pnand %p1608_p9, %p2341_p11  ;;  %p1615_p13 = scmp.lt.s32.totalorder %s1613_s7, %s1607_s19 }
  0xcc   : > { %p1610_p10 = pneg %p1609_p0  ;;  %p1616_p3 = por %p1615_p13, %p1614_p5 }
  0xcd   : > { %1311 = vmatpush3.bf16.msra.mxu0 %v1451_v8 }
  0xce   : > { %1322 = vmatprep.subr.bf16.mxu0 %v1738_v0  ;;  %p1617_p4 = pnand %p1616_p3, %p1610_p10 }
  0xd0   : > { %1313 = vmatmul.mubr.msk.bf16.vlgmr.msra.gmra.mrb[4].mxu0 %vm555_vm0, %v1452_v9 }
  0xd1   : > { %1324 = vmatprep.mubr.msk.bf16.mxu0 %vm1739_vm1, %v1738_v0 }
 0x19b   : > { %v593_v12 = vpop.f32.mrb[0].mxu0  ;;  %v677_v14 = vpop.f32.mrb[0].mxu1 }
 0x19c   : > { %v594_v13 = vadd.f32 %v1243_v10, %v593_v12  ;;  %v1298_v15 = vpop.f32.mrb[1].mxu0  ;;  %v678_v16 = vadd.f32 %v1248_v11, %v677_v14  ;;  %v1306_v17 = vpop.f32.mrb[1].mxu1 }
 0x19d   : > { %v596_v18 = vpop.f32.mrb[2].mxu0  ;;  %v680_v21 = vpop.f32.mrb[2].mxu1 }
 0x19e   : > { %v600_v19 = vpack.c.bf16 %v594_v13, %v594_v13  ;;  %v597_v20 = vadd.f32 %v1243_v10, %v596_v18  ;;  %v1299_v22 = vpop.f32.mrb[3].mxu0  ;;  %v758_v23 = vpack.c.bf16 %v678_v16, %v678_v16  ;;  %v681_v24 = vadd.f32 %v1248_v11, %v680_v21  ;;  %v1307_v25 = vpop.f32.mrb[3].mxu1 }
 0x1a0   : > { %603 = vst.msk [vmem:[#allocation2] sm:$0xf] %vm602_vm2, %v600_v19  ;;  %v601_v26 = vpack.c.bf16 %v597_v20, %v597_v20  ;;  %v764_v27 = vsel %vm555_vm0, %v758_v23, 0  ;;  %v759_v28 = vpack.c.bf16 %v681_v24, %v681_v24 }
 0x1a1   : > { %1317 = vmatpush3.bf16.xpose.msra.mxu1 %v764_v27 }
 0x1a2   : > { %604 = vst.msk [vmem:[#allocation2 + $0x4] sm:$0xf] %vm602_vm2, %v601_v26  ;;  %v810_v29 = vsel %vm555_vm0, %v759_v28, 0  ;;  %1328 = vmatprep.subr.bf16.mxu1 %v1738_v0 }
 0x1a3   : > { %1323 = vmatpush3.bf16.xpose.msra.mxu0 %v810_v29  ;;  %v749_v33 = vpop.f32.mrb[4].mxu0 }
 0x1a4   : > { %1334 = vmatprep.subr.bf16.mxu0 %v1738_v0  ;;  %v750_v34 = vadd.f32 %v1253_v32, %v749_v33  ;;  %v1314_v35 = vpop.f32.mrb[5].mxu0 }
 0x1a5   : > { %v752_v36 = vpop.f32.mrb[6].mxu0 }
 0x1a6   : > { %v897_v37 = vpack.c.bf16 %v750_v34, %v750_v34  ;;  %v753_v38 = vadd.f32 %v1253_v32, %v752_v36  ;;  %v1315_v39 = vpop.f32.mrb[7].mxu0 }
 0x1a7   : > { %v756_v30 = vld [vmem:[#allocation2] sm:$0xf] }
 0x1a8   : > { %1319 = vmatmul.mubr.msk.bf16.vlgmr.msra.gmra.mrb[4].mxu1 %vm555_vm0, %v756_v30  ;;  %v904_v40 = vsel %vm902_vm3, %v897_v37, 0  ;;  %v898_v41 = vpack.c.bf16 %v753_v38, %v753_v38 }
 0x1a9   : > { %v757_v31 = vld [vmem:[#allocation2 + $0x4] sm:$0xf]  ;;  %1330 = vmatprep.mubr.msk.bf16.mxu1 %vm1739_vm1, %v1738_v0  ;;  %1329 = vmatpush3.bf16.msra.mxu1 %v904_v40 }
 0x1aa   : > { %1325 = vmatmul.mubr.msk.bf16.vlgmr.msra.gmra.mrb[8].mxu0 %vm555_vm0, %v757_v31  ;;  %v950_v42 = vsel %vm902_vm3, %v898_v41, 0 }
 0x1ab   : > { %1336 = vmatprep.mubr.msk.bf16.mxu0 %vm1739_vm1, %v1738_v0  ;;  %1335 = vmatpush3.bf16.msra.mxu0 %v950_v42 }
 0x27b   : > { %v800_v43 = vpop.f32.mrb[4].mxu1 }
 0x27c   : > { %v853_v44 = vsel %vm852_vm4, %v800_v43, -inf  ;;  %v1320_v45 = vpop.f32.mrb[5].mxu1 }
 0x27d   : > { %v854_v46 = vrot.slane %v853_v44, 4  ;;  %v803_v47 = vpop.f32.mrb[6].mxu1  ;;  %v846_v48 = vpop.f32.mrb[8].mxu0 }
 0x27e   : > { %v860_v49 = vsel %vm852_vm4, %v846_v48, -inf  ;;  %v1321_v50 = vpop.f32.mrb[7].mxu1  ;;  %v1326_v51 = vpop.f32.mrb[9].mxu0 }
 0x27f   : > { %v855_v52 = vmax.f32 %v853_v44, %v854_v46  ;;  %v861_v53 = vrot.slane %v860_v49, 4  ;;  %v849_v54 = vpop.f32.mrb[10].mxu0 }
 0x280   : > { %v1327_v55 = vpop.f32.mrb[11].mxu0 }
 0x281   : > { %v856_v56 = vrot.slane %v855_v52, 2  ;;  %v862_v57 = vmax.f32 %v860_v49, %v861_v53 }
 0x283   : > { %v857_v58 = vmax.f32 %v855_v52, %v856_v56  ;;  %v863_v59 = vrot.slane %v862_v57, 2 }
 0x285   : > { %v858_v60 = vrot.slane %v857_v58, 1  ;;  %v864_v61 = vmax.f32 %v862_v57, %v863_v59 }
 0x287   : > { %v859_v62 = vmax.f32 %v857_v58, %v858_v60  ;;  %v865_v63 = vrot.slane %v864_v61, 1 }
 0x289   : > { %v867_v0 = vsub.f32 %v800_v43, %v859_v62  ;;  %v866_v1 = vmax.f32 %v864_v61, %v865_v63 }
 0x28b   : > { %v869_v2 = vmul.f32 1.442695, %v867_v0  ;;  %v868_v3 = vsub.f32 %v846_v48, %v866_v1 }
 0x28d   : > { %1453 = vpow2.f32 %v869_v2  ;;  %v871_v4 = vmul.f32 1.442695, %v868_v3 }
 0x28f   : > { %1455 = vpow2.f32 %v871_v4 }
 0x297   : > { %v1454_v5 = vpop.eup %1453 }
 0x298   : > { %v873_v6 = vsel %vm852_vm4, %v1454_v5, 0.0 }
 0x299   : > { %v1456_v7 = vpop.eup %1455  ;;  %v874_v8 = vrot.slane %v873_v6, 4 }
 0x29a   : > { %v880_v9 = vsel %vm852_vm4, %v1456_v7, 0.0 }
 0x29b   : > { %v875_v10 = vadd.f32 %v874_v8, %v873_v6  ;;  %v881_v11 = vrot.slane %v880_v9, 4 }
 0x29d   : > { %v876_v12 = vrot.slane %v875_v10, 2  ;;  %v882_v13 = vadd.f32 %v881_v11, %v880_v9 }
 0x29f   : > { %v877_v14 = vadd.f32 %v876_v12, %v875_v10  ;;  %v883_v15 = vrot.slane %v882_v13, 2 }
 0x2a1   : > { %v878_v16 = vrot.slane %v877_v14, 1  ;;  %v884_v17 = vadd.f32 %v883_v15, %v882_v13 }
 0x2a3   : > { %v879_v18 = vadd.f32 %v878_v16, %v877_v14  ;;  %v885_v19 = vrot.slane %v884_v17, 1 }
 0x2a5   : > { %1457 = vrcp.f32 %v879_v18  ;;  %v886_v20 = vadd.f32 %v885_v19, %v884_v17 }
 0x2a7   : > { %1459 = vrcp.f32 %v886_v20 }
 0x2af   : > { %v1458_v21 = vpop.eup %1457 }
 0x2b0   : > { %v889_v22 = vmul.f32 %v1458_v21, %v1454_v5 }
 0x2b1   : > { %v1460_v23 = vpop.eup %1459 }
 0x2b2   : > { %v890_v24 = vmul.f32 %v1460_v23, %v1456_v7  ;;  %v895_v25 = vpack.c.bf16 %v889_v22, %v889_v22  ;;  %891 = vst.msk [vmem:[%s514_s21] sm:$0xff] %vm852_vm4, %v889_v22 }
 0x2b4   : > { %1331 = vmatmul.mubr.msk.bf16.vlgmr.msra.gmra.mrb[8].mxu1 %vm852_vm4, %v895_v25  ;;  %v896_v26 = vpack.c.bf16 %v890_v24, %v890_v24  ;;  %892 = vst.msk [vmem:[%s514_s21 + $0x8] sm:$0xff] %vm852_vm4, %v890_v24 }
 0x2b6   : > { %1337 = vmatmul.mubr.msk.bf16.vlgmr.msra.gmra.mrb[12].mxu0 %vm852_vm4, %v896_v26 }
 0x2b7   : > { %1620 = shalt.err (!%p1617_p4)
}
 0x2b8   : > { %s1621_s1 = scalar_lea.hbm %s2164_s29, 256  ;;  %s1625_s9 = scalar_lea.hbm %s2340_s25, 1024 }
 0x2b9   : > { %p1622_p8 = scmp.ne.s32.totalorder %s2164_s29, %s1621_s1  ;;  %p1626_p6 = scmp.lt.u32.totalorder %s2164_s29, %s2340_s25 }
 0x2ba   : > { %p1627_p7 = scmp.lt.u32.totalorder %s1625_s9, %s1621_s1  ;;  %p1629_p9 = scmp.lt.u32.totalorder %s1621_s1, %s2164_s29 }
 0x2bb   : > { %p1623_p12 = pnand %p1622_p8, %p2341_p11 }
 0x2bc   : > { %p1628_p2 = por %p1627_p7, %p1626_p6 }
 0x2bd   : > { %p1624_p1 = pneg %p1623_p12 }
 0x2be   : > { %p1630_p0 = por %p1629_p9, %p1628_p2 }
 0x2c0   : > { %p1631_p10 = pnand %p1630_p0, %p1624_p1 }
 0x2c2   : > { %1634 = shalt.err (!%p1631_p10)
}
 0x2c3   : > { %s1741_s21 = smov 128   ;;  %s1742_s10 = smov 8   ;;  %v893_v27 = vld [vmem:[#allocation3] sm:$0xff]  ;;  %v894_v29 = vld [vmem:[#allocation3 + $0x8] sm:$0xff] }
 0x2c4   : > { %1355 = dma.vmem_to_hbm [thread:$0]  (%p2341_p11), %s2166_s17, 256, %s2164_s29, %s1009_s11, %s1741_s21, %s1741_s21, %s1742_s10  }
 0x2c5   : > { %s507_s23 = scalar_lea.vmem [#allocation13], %s1241_s20  ;;  %s2342_s11 = sld [smem:[#allocation32_spill]] }
 0x2c6   : > { %s1022_s16 = sshll.u32 %s507_s23, 4  ;;  %s1004_s22 = scalar_lea.sflag [#allocation6], %s2073_s13  ;;  %s2207_s16 = int_to_ptr.vmem [resolvable:$true] %s1022_s16 }
 0x2c7   : > { %s1635_s20 = scalar_lea.vmem %s2207_s16, 256  ;;  %s1743_s27 = smov [#allocation13]  }
 0x2c8   : > { %p1636_p5 = scmp.ne.s32.totalorder %s2207_s16, %s1635_s20  ;;  %s1639_s30 = sshll.u32 %s1743_s27, 4  ;;  %s1640_s30 = int_to_ptr.vmem [resolvable:$false] %s1639_s30 }
 0x2c9   : > { %s1641_s7 = scalar_lea.vmem %s1640_s30, 512  ;;  %p1642_p4 = scmp.lt.s32.totalorder %s2207_s16, %s1640_s30 }
 0x2ca   : > { %p1637_p13 = pnand %p1636_p5, %p2341_p11  ;;  %p1643_p8 = scmp.lt.s32.totalorder %s1641_s7, %s1635_s20 }
 0x2cb   : > { %s2205_s19 = scalar_lea.hbm %s2342_s11, %s1273_s3 }
 0x2cc   : > { %p1638_p3 = pneg %p1637_p13  ;;  %p1644_p12 = por %p1643_p8, %p1642_p4 }
 0x2ce   : > { %p1645_p1 = pnand %p1644_p12, %p1638_p3 }
 0x387   : > { %v940_v28 = vpop.f32.mrb[8].mxu1 }
 0x388   : > { %v992_v30 = vadd.f32 %v940_v28, %v893_v27  ;;  %v1332_v31 = vpop.f32.mrb[9].mxu1 }
 0x389   : > { %v943_v32 = vpop.f32.mrb[10].mxu1  ;;  %v986_v33 = vpop.f32.mrb[12].mxu0 }
 0x38a   : > { %994 = vst.msk [vmem:[#allocation3] sm:$0xff] %vm555_vm0, %v992_v30  ;;  %v993_v34 = vadd.f32 %v986_v33, %v894_v29  ;;  %v1333_v35 = vpop.f32.mrb[11].mxu1  ;;  %v1338_v36 = vpop.f32.mrb[13].mxu0 }
 0x38b   : > { %v989_v37 = vpop.f32.mrb[14].mxu0 }
 0x38c   : > { %995 = vst.msk [vmem:[#allocation3 + $0x8] sm:$0xff] %vm555_vm0, %v993_v34  ;;  %v1339_v38 = vpop.f32.mrb[15].mxu0 }
 0x391   : > { %v999_v39 = vld [vmem:[#allocation3] sm:$0xff] }
 0x392   : > { %1001 = vst.msk [vmem:[%s507_s23] sm:$0xff] %vm555_vm0, %v999_v39 }
 0x393   : > { %v1000_v40 = vld [vmem:[#allocation3 + $0x8] sm:$0xff] }
 0x394   : > { %1002 = vst.msk [vmem:[%s507_s23 + $0x8] sm:$0xff] %vm555_vm0, %v1000_v40 }
 0x395   : > { %1648 = shalt.err (!%p1645_p1)
}
 0x396   : > { %s1649_s3 = scalar_lea.hbm %s2205_s19, 256  ;;  %s1653_s12 = scalar_lea.hbm %s2342_s11, 1024 }
 0x397   : > { %p1650_p6 = scmp.ne.s32.totalorder %s2205_s19, %s1649_s3  ;;  %p1654_p9 = scmp.lt.u32.totalorder %s2205_s19, %s2342_s11 }
 0x398   : > { %p1655_p0 = scmp.lt.u32.totalorder %s1653_s12, %s1649_s3  ;;  %p1657_p5 = scmp.lt.u32.totalorder %s1649_s3, %s2205_s19 }
 0x399   : > { %p1651_p7 = pnand %p1650_p6, %p2341_p11 }
 0x39a   : > { %p1656_p10 = por %p1655_p0, %p1654_p9 }
 0x39b   : > { %p1652_p2 = pneg %p1651_p7 }
 0x39c   : > { %p1658_p13 = por %p1657_p5, %p1656_p10 }
 0x39e   : > { %p1659_p3 = pnand %p1658_p13, %p1652_p2 }
 0x3a0   : > { %1662 = shalt.err (!%p1659_p3)
}
 0x3a1   : > { %1354 = dma.vmem_to_hbm [thread:$0]  (%p2341_p11), %s2207_s16, 256, %s2205_s19, %s1004_s22, %s1741_s21, %s1741_s21, %s1742_s10  }
 0x3a2 PF: > { %s2343_s26 = sld [smem:[#allocation24_spill]]  ;;  %s2344_s23 = sld [smem:[#allocation21_spill]] }
 0x3a3   : > { %s2345_s29 = sld [smem:[#allocation26_spill]] }
 0x3a8   : > { %p1387_p4 = scmp.ge.s32.totalorder %s2343_s26, 2  ;;  %s1054_s17 = sand.u32 1, %s2344_s23  }
 0x3a9   : > { %p2346_p8 = scmp.ne.s32.totalorder %s2345_s29, 0  ;;  %s1055_s20 = scalar_lea.sflag [#allocation6], %s1054_s17 }
 0x3ab   : > { %p1376_p12 = pnand %p1387_p4, %p2346_p8 }
 0x3ad   : > { %1700 = dma.done.wait (!%p1376_p12), %s1055_s20, 256  }
 0x3ae   : > { %1702 = vsyncadd (!%p1376_p12), %s1055_s20, 4294967040  ;;  %s1064_s24 = scalar_lea.sflag [#allocation15], %s1054_s17 }
 0x3af   : > { %1704 = dma.done.wait (!%p1376_p12), %s1064_s24, 256  }
 0x3b0   : > { %1706 = vsyncadd (!%p1376_p12), %s1064_s24, 4294967040  ;;  %s34_s18 = sadd.s32 1, %s2343_s26   ;;  %s2347_s21 = sld [smem:[#allocation28_spill]] }
 0x3b1   : > { %p31_p1 = scmp.ge.s32.totalorder %s34_s18, 6   ;;  %s2348_s16 = sld [smem:[#allocation23_spill]] }
 0x3b2   : > { %s2349_s17 = sld [smem:[#allocation27_spill]]  ;;  %s2350_s13 = smov %s1713_s14 }
 0x3b3   : > { %s2351_s14 = smov %s1717_s15  ;;  %33 = sbr.rel (!%p31_p1) target bundleno = 17 (0x11), region = 158 }
 0x3b6   : > { %s2352_s15 = smov %s2347_s21 }
 0x3ba   :  { %1069 = vsyncpa [#allocation5], 1 }
 0x3bb   :  { %1071 = vsyncpa [#allocation5 + $0x1], 1 }
 0x3bc   :  { %1072 = vsyncpa [#allocation8], 1 }
 0x3bd   :  { %1074 = vsyncpa [#allocation8 + $0x1], 1 }
 0x3be   :  { %1075 = vsyncpa [#allocation11], 1 }
 0x3bf   :  { %1076 = vsyncpa [#allocation6], 1 }
 0x3c0   :  { %1078 = vsyncpa [#allocation6 + $0x1], 1 }
 0x3c1   :  { %1079 = vsyncpa [#allocation15], 1 }
 0x3c2   :  { %1081 = vsyncpa [#allocation15 + $0x1], 1 }

</bundles_post_ra>
